<compile_context>
chip_gen: v6e
topology: v6e:2x2x1
jax: 0.10.0
libtpu: 0.0.40
codegen_flags: <defaults>
</compile_context>

<pallas_src>
import functools

import jax
import jax.numpy as jnp
from jax.experimental import pallas as pl
from jax.experimental.pallas import tpu as pltpu


def _round_up(x, m):
    return (x + m - 1) // m * m


def _fused_linear_kernel(x_ref, w_ref, b_ref, o_ref):
    # One MXU matmul + one VPU bias add. Output lane dim is a multiple of 128
    # (padded in the wrapper), so this store is unmasked / lane-dense.
    o_ref[...] = (
        jnp.dot(x_ref[...], w_ref[...], preferred_element_type=jnp.float32)
        + b_ref[...]
    ).astype(o_ref.dtype)


def prepare_params(params):
    """One-time parameter preparation, hoisted out of the per-call path.

    Composes the activation-free 4-layer MLP into a single effective linear
    (exact in f32 up to rounding-order) and pads the output dim to a multiple
    of 128 for lane-dense stores.

    Returns (w_eff [in_dim, n_pad], b_eff [1, n_pad], out_dim).
    """
    w1, w2, w3, w4 = (jnp.asarray(params[f"w{i}"], jnp.float32) for i in (1, 2, 3, 4))
    b1, b2, b3, b4 = (jnp.asarray(params[f"b{i}"], jnp.float32) for i in (1, 2, 3, 4))

    # Torch linear is y = x @ W.T + b  =>  effective weight is W1.T@W2.T@W3.T@W4.T.
    w_eff = w1.T @ w2.T @ w3.T @ w4.T                         # [in_dim, out_dim]
    b_eff = ((b1 @ w2.T + b2) @ w3.T + b3) @ w4.T + b4        # [out_dim]

    out_dim = w_eff.shape[1]
    n_pad = _round_up(out_dim, 128)
    if n_pad != out_dim:
        w_eff = jnp.pad(w_eff, ((0, 0), (0, n_pad - out_dim)))
        b_eff = jnp.pad(b_eff, (0, n_pad - out_dim))
    b_eff = b_eff.reshape(1, n_pad)
    return w_eff, b_eff, out_dim


@functools.partial(jax.jit, static_argnames=("out_dim", "tm"))
def mlp_forward(x, w_eff, b_eff, *, out_dim, tm=256):
    """x: [batch, in_dim]; w_eff/b_eff from prepare_params(). Returns [batch, out_dim]."""
    batch, k = x.shape
    n_pad = w_eff.shape[1]

    # Pad batch to a multiple of the sublane count (8) and of the batch tile.
    tile_m = _round_up(min(tm, _round_up(batch, 8)), 8)
    b_pad = _round_up(batch, tile_m)
    if b_pad != batch:
        x = jnp.pad(x, ((0, b_pad - batch), (0, 0)))

    out = pl.pallas_call(
        _fused_linear_kernel,
        out_shape=jax.ShapeDtypeStruct((b_pad, n_pad), jnp.float32),
        grid_spec=pltpu.PrefetchScalarGridSpec(
            num_scalar_prefetch=0,
            grid=(b_pad // tile_m,),
            in_specs=[
                pl.BlockSpec((tile_m, k), lambda i: (i, 0)),     # activations: tiled over batch
                pl.BlockSpec((k, n_pad), lambda i: (0, 0)),      # weights: VMEM-resident
                pl.BlockSpec((1, n_pad), lambda i: (0, 0)),      # bias: VMEM-resident
            ],
            out_specs=pl.BlockSpec((tile_m, n_pad), lambda i: (i, 0)),
        ),
        compiler_params=pltpu.CompilerParams(
            dimension_semantics=("parallel",)),
    )(x, w_eff, b_eff)

    # Strip batch + lane padding outside the kernel.
    return out[:batch, :out_dim]


def _init_linear(key, in_f, out_f):
    # Match torch.nn.Linear default init: U(-1/sqrt(in), 1/sqrt(in)).
    kw, kb = jax.random.split(key)
    bound = 1.0 / (in_f ** 0.5)
    w = jax.random.uniform(kw, (out_f, in_f), jnp.float32, -bound, bound)
    b = jax.random.uniform(kb, (out_f,), jnp.float32, -bound, bound)
    return w, b


if __name__ == "__main__":
    # Shapes consistent with the module's forward:
    #   in_dim=32, n_hidden_1=64, n_hidden_2=64, n_hidden_3=32, out_dim=16
    batch, in_dim, h1, h2, h3, out_dim = 8, 32, 64, 64, 32, 16

    key = jax.random.PRNGKey(0)
    kx, k1, k2, k3, k4 = jax.random.split(key, 5)

    x = jax.random.normal(kx, (batch, in_dim), jnp.float32)

    params = {}
    for i, (kk, fi, fo) in enumerate(
            [(k1, in_dim, h1), (k2, h1, h2), (k3, h2, h3), (k4, h3, out_dim)], 1):
        w, b = _init_linear(kk, fi, fo)
        params[f"w{i}"] = w
        params[f"b{i}"] = b

    # One-time parameter preparation (layer composition + lane padding).
    w_eff, b_eff, od = prepare_params(params)
    w_eff, b_eff = jax.block_until_ready((w_eff, b_eff))

    out = mlp_forward(x, w_eff, b_eff, out_dim=od)
    jax.block_until_ready(out)

    # Reference: the original 4-layer chain in plain JAX (same math as torch).
    ref = x
    for i in (1, 2, 3, 4):
        ref = ref @ params[f"w{i}"].T + params[f"b{i}"]
    assert out.shape == (batch, od)
    # f32 pre-composition changes rounding order slightly -> 1e-4 tolerance.
    assert jnp.allclose(out, ref, atol=1e-4, rtol=1e-4), float(
        jnp.max(jnp.abs(out - ref)))

    print("KERNEL_OK")
</pallas_src>

<mosaic_0001>
module attributes {stable_mosaic.version = 11 : i64} {
  func.func @_fused_linear_kernel(%arg0: i32, %arg1: memref<8x32xf32, #tpu.memory_space<vmem>>, %arg2: memref<32x128xf32, #tpu.memory_space<vmem>>, %arg3: memref<1x128xf32, #tpu.memory_space<vmem>>, %arg4: memref<8x128xf32, #tpu.memory_space<vmem>>) attributes {dimension_semantics = [#tpu.dimension_semantics<parallel>], iteration_bounds = array<i64: 1>, scalar_prefetch = 0 : i64, scratch_operands = 0 : i64, tpu.core_type = #tpu.core_type<tc>, window_params = [{transform_indices = @transform_0, window_bounds = array<i64: 8, 32>}, {pipeline_mode = #tpu.pipeline_mode<synchronous>, transform_indices = @transform_1, window_bounds = array<i64: 32, 128>}, {pipeline_mode = #tpu.pipeline_mode<synchronous>, transform_indices = @transform_2, window_bounds = array<i64: 1, 128>}, {transform_indices = @transform_3, window_bounds = array<i64: 8, 128>}]} {
    %c0 = arith.constant 0 : index
    %c0_0 = arith.constant 0 : index
    %0 = vector.load %arg1[%c0, %c0_0] : memref<8x32xf32, #tpu.memory_space<vmem>>, vector<8x32xf32>
    %c0_1 = arith.constant 0 : index
    %c0_2 = arith.constant 0 : index
    %1 = vector.load %arg2[%c0_1, %c0_2] : memref<32x128xf32, #tpu.memory_space<vmem>>, vector<32x128xf32>
    %cst = arith.constant dense<0.000000e+00> : vector<8x128xf32>
    %2 = tpu.matmul %0, %1, %cst {dimension_numbers = #tpu.dot_dimension_numbers<[1], [0], [0], [1], [0, 0, 1, 1], [], []>} : vector<8x32xf32>, vector<32x128xf32>, vector<8x128xf32> -> vector<8x128xf32>
    %c0_3 = arith.constant 0 : index
    %c0_4 = arith.constant 0 : index
    %3 = vector.load %arg3[%c0_3, %c0_4] : memref<1x128xf32, #tpu.memory_space<vmem>>, vector<1x128xf32>
    %4 = vector.broadcast %3 : vector<1x128xf32> to vector<8x128xf32>
    %5 = arith.addf %2, %4 : vector<8x128xf32>
    %c0_5 = arith.constant 0 : index
    %c0_6 = arith.constant 0 : index
    %6 = vector.load %arg4[%c0_5, %c0_6] : memref<8x128xf32, #tpu.memory_space<vmem>>, vector<8x128xf32>
    tpu.vector_store %arg4[%c0_5, %c0_6], %5 {strides = array<i32>} : memref<8x128xf32, #tpu.memory_space<vmem>>, vector<8x128xf32>,
    return
  }
  func.func @transform_0(%arg0: i32) -> (i32, i32) {
    %c0_i32 = arith.constant 0 : i32
    %c0_i32_0 = arith.constant 0 : i32
    return %arg0, %c0_i32 : i32, i32
  }
  func.func @transform_1(%arg0: i32) -> (i32, i32) {
    %c0_i32 = arith.constant 0 : i32
    %c0_i32_0 = arith.constant 0 : i32
    %c0_i32_1 = arith.constant 0 : i32
    return %c0_i32, %c0_i32_0 : i32, i32
  }
  func.func @transform_2(%arg0: i32) -> (i32, i32) {
    %c0_i32 = arith.constant 0 : i32
    %c0_i32_0 = arith.constant 0 : i32
    %c0_i32_1 = arith.constant 0 : i32
    return %c0_i32, %c0_i32_0 : i32, i32
  }
  func.func @transform_3(%arg0: i32) -> (i32, i32) {
    %c0_i32 = arith.constant 0 : i32
    %c0_i32_0 = arith.constant 0 : i32
    return %arg0, %c0_i32 : i32, i32
  }
}

</mosaic_0001>

<bundles_post_ra>
// kernel: mlp_forward.1
= control target key start
LH: loop header
LB: loop body
LE: loop exit
PB: predicated region body
PF: predicated region fallthrough
CT: control target
= control target key end

     0   :  { %8 = vsyncpa [#allocation3], 0  ;;  %s274_s0 = inlined_call_operand.hbm [shape: f32[8,32], index: 0, kind: input, shape index: {}]   ;;  %s275_s1 = inlined_call_operand.hbm [shape: f32[32,128], index: 1, kind: input, shape index: {}]   ;;  %s276_s2 = inlined_call_operand.vmem [shape: f32[1,128], index: 2, kind: input, shape index: {}]   ;;  %s277_s3 = inlined_call_operand.hbm [shape: f32[8,128], index: 3, kind: output, shape index: {}]  }
   0x1   :  { %9 = vsyncpa [#allocation6], 0 }
   0x2   :  { %10 = vsyncpa [#allocation4], 0  ;;  %s235_s12 = smov [#allocation2]   ;;  %s236_s14 = smov [#allocation5]  }
   0x3   :  { %s17_s13 = sshll.u32 %s235_s12, 4  ;;  %s26_s15 = sshll.u32 %s236_s14, 4  ;;  %s18_s13 = int_to_ptr.vmem [resolvable:$true] %s17_s13  ;;  %s27_s15 = int_to_ptr.vmem [resolvable:$true] %s26_s15 }
   0x4   :  { %s177_s16 = scalar_lea.vmem %s18_s13, 128  ;;  %p182_p1 = scmp.lt.s32.totalorder %s18_s13, %s18_s13 }
   0x5   :  { %p178_p0 = scmp.ne.s32.totalorder %s18_s13, %s177_s16  ;;  %p183_p2 = scmp.lt.s32.totalorder %s177_s16, %s177_s16 }
   0x7   :  { %p184_p3 = por %p183_p2, %p182_p1 }
   0x9   :  { %p185_p4 = pnand %p184_p3, %p178_p0 }
   0xb   :  { %188 = shalt.err (!%p185_p4)
}
   0xc   :  { %20 = dma.hbm_to_vmem [thread:$0]  %s274_s0, 128, %s18_s13, [#allocation3]  }
   0xd   :  { %s197_s19 = scalar_lea.vmem %s27_s15, 512  ;;  %p202_p6 = scmp.lt.s32.totalorder %s27_s15, %s27_s15 }
   0xe   :  { %p198_p5 = scmp.ne.s32.totalorder %s27_s15, %s197_s19  ;;  %p203_p7 = scmp.lt.s32.totalorder %s197_s19, %s197_s19 }
  0x10   :  { %p204_p8 = por %p203_p7, %p202_p6 }
  0x12   :  { %p205_p9 = pnand %p204_p8, %p198_p5 }
  0x14   :  { %208 = shalt.err (!%p205_p9)
}
  0x15   :  { %s237_s20 = smov 128   ;;  %s238_s21 = smov 8  }
  0x16   :  { %32 = dma.hbm_to_vmem [thread:$0]  %s275_s1, 512, %s27_s15, [#allocation6], %s237_s20, %s237_s20, %s238_s21  }
  0x17   :  { %229 = dma.done.wait [#allocation3], 128  }
  0x18   :  { %230 = vsyncadd [#allocation3], 4294967168 }
  0x19   :  { %231 = dma.done.wait [#allocation6], 512  }
  0x1a   :  { %232 = vsyncadd [#allocation6], 4294966784  ;;  %v239_v0 = vmov 0.0   ;;  %vm240_vm0 = vmmov 0   ;;  %v45_v1 = vld [vmem:[#allocation5 + $0x18] sm:$0xff]  ;;  %v44_v2 = vld [vmem:[#allocation5 + $0x10] sm:$0xff] }
  0x1b   :  { %151 = vmatprep.subr.mxu0 %v239_v0  ;;  %159 = vmatprep.mubr.msk.f32.mxu0 %vm240_vm0, %v239_v0  ;;  %v43_v3 = vld [vmem:[#allocation5 + $0x8] sm:$0xff]  ;;  %v42_v4 = vld [vmem:[#allocation5] sm:$0xff]  ;;  %v41_v5 = vld [vmem:[#allocation2] sm:$0xff]  ;;  %vm53_vm1 = vcmask 261120   ;;  %s241_s24 = smov [#allocation7]  }
  0x1c   :  { %152 = vmatpush3.msra.mxu0 %v45_v1  ;;  %v144_v6 = vld [vmem:[%s276_s2] ss:$0 sm:$0xff]  ;;  %s134_s25 = sshll.u32 %s241_s24, 4  ;;  %s135_s25 = int_to_ptr.vmem [resolvable:$true] %s134_s25 }
  0x1d   :  { %153 = vmatprep.subr.mxu0 %v239_v0  ;;  %s209_s26 = scalar_lea.vmem %s135_s25, 128  ;;  %p214_p11 = scmp.lt.s32.totalorder %s135_s25, %s135_s25 }
  0x1e   :  { %154 = vmatpush3.msra.mxu0 %v44_v2  ;;  %p210_p10 = scmp.ne.s32.totalorder %s135_s25, %s209_s26  ;;  %p215_p12 = scmp.lt.s32.totalorder %s209_s26, %s209_s26 }
  0x1f   :  { %155 = vmatprep.subr.mxu0 %v239_v0 }
  0x20   :  { %156 = vmatpush3.msra.mxu0 %v43_v3  ;;  %p216_p13 = por %p215_p12, %p214_p11 }
  0x21   :  { %157 = vmatprep.subr.mxu0 %v239_v0 }
  0x22   :  { %158 = vmatpush3.msra.mxu0 %v42_v4  ;;  %p217_p0 = pnand %p216_p13, %p210_p10 }
  0x23   :  { %160 = vmatmul.mubr.msk.f32.vlgmr.msra.gmra.mxu0 %vm53_vm1, %v41_v5 }
  0xe3   :  { %v123_v7 = vpop.f32.mrf.mxu0 }
  0xe4   :  { %v124_v8 = vadd.f32 %v144_v6, %v123_v7 }
  0xe5   :  { %v161_v9 = vpop.f32.mrf.mxu0 }
  0xe6   :  { %127 = vst [vmem:[#allocation7] sm:$0xff] %v124_v8 }
  0xe7   :  { %220 = shalt.err (!%p217_p0)
}
  0xe8   :  { %137 = dma.vmem_to_hbm [thread:$0]  %s135_s25, 128, %s277_s3, [#allocation4]  }
  0xe9   :  { %233 = dma.done.wait [#allocation4], 128  }
  0xea   :  { %234 = vsyncadd [#allocation4], 4294967168 }
  0xeb   :  { %141 = vsyncpa [#allocation3], 1 }
  0xec   :  { %142 = vsyncpa [#allocation6], 1 }
  0xed   :  { %143 = vsyncpa [#allocation4], 1 }

</bundles_post_ra>
